<compile_context>
chip_gen: v7x
topology: tpu7x:2x2x1
jax: 0.10.0
libtpu: 0.0.40
codegen_flags: <defaults>
</compile_context>

<pallas_src>
import functools
import math

import jax
import jax.numpy as jnp
from jax import lax
from jax.experimental import pallas as pl
from jax.experimental.pallas import tpu as pltpu

_LANE = 128
_SUB = 8


def _row_sum_kernel(w_ref, logp_ref, out_ref, *, tb, tv, cw, b_total, v_total,
                    has_row_edge, has_col_edge):
    """Accumulate sum_rows w[row] * sum_cols logq[row, col] into a lane-dense (8,128) block.

    w_ref   : (tb, 1)  f32      per-row weight (smoothing; 0 for ignored / padded rows)
    logp_ref: (tb, tv) f32/bf16 model log-probabilities, class tile j
    out_ref : (8, 128) f32      partial sums for batch tile i (resident across j)
    """
    i = pl.program_id(0)
    j = pl.program_id(1)
    n_chunks = tv // cw

    @pl.when(j == 0)
    def _init():
        out_ref[...] = jnp.zeros_like(out_ref)

    col_iota = lax.broadcasted_iota(jnp.int32, (_SUB, cw), 1)   # hoisted, loop-invariant
    row_iota = lax.broadcasted_iota(jnp.int32, (_SUB, 1), 0)

    def _accumulate(mask_rows, mask_cols):
        def row_block(r, step_acc):
            rr = pl.multiple_of(r * _SUB, _SUB)
            wv = w_ref[pl.ds(rr, _SUB), :]                      # (8, 1) f32
            if mask_rows:
                row_ok = (i * tb + rr + row_iota) < b_total     # (8, 1) bool
            acc = jnp.zeros((_SUB, cw), jnp.float32)
            for c in range(n_chunks):                           # static unroll
                x = logp_ref[pl.ds(rr, _SUB),
                             pl.ds(c * cw, cw)].astype(jnp.float32)
                if mask_cols and mask_rows:
                    ok = row_ok & (col_iota < (v_total - j * tv - c * cw))
                elif mask_cols:
                    ok = col_iota < (v_total - j * tv - c * cw)
                elif mask_rows:
                    ok = row_ok
                else:
                    ok = None
                if ok is not None:
                    # select (not multiply) so OOB garbage never yields 0*Inf = NaN
                    x = jnp.where(ok, x, 0.0)
                acc = acc + x
            # fold (8, cw) -> (8, 128): cheap VALU adds
            acc128 = acc[:, 0:_LANE]
            for c in range(1, cw // _LANE):
                acc128 = acc128 + acc[:, c * _LANE:(c + 1) * _LANE]
            # per-row weight applied once per row block (not per element)
            return step_acc + wv * acc128

        step = lax.fori_loop(0, tb // _SUB, row_block,
                             jnp.zeros((_SUB, _LANE), jnp.float32))
        out_ref[...] += step

    if not (has_row_edge or has_col_edge):
        _accumulate(False, False)
    else:
        conds = []
        if has_row_edge:
            conds.append(i == pl.num_programs(0) - 1)
        if has_col_edge:
            conds.append(j == pl.num_programs(1) - 1)
        on_edge = conds[0] if len(conds) == 1 else jnp.logical_or(conds[0], conds[1])

        @pl.when(jnp.logical_not(on_edge))
        def _fast():
            _accumulate(False, False)

        @pl.when(on_edge)
        def _edge():
            _accumulate(has_row_edge, has_col_edge)


def _round_up(x, m):
    return ((x + m - 1) // m) * m


def _cdiv(a, b):
    return -(-a // b)


def label_smoothing_loss(output, target, *, label_smoothing, tgt_vocab_size,
                         ignore_index=-100):
    """output: (B, n_classes) log-probs (f32 or bf16); target: (B,) int. Returns scalar f32."""
    assert 0.0 < label_smoothing <= 1.0
    assert tgt_vocab_size > 2, "smoothing divides by tgt_vocab_size - 2"
    B, V = output.shape
    smoothing = float(label_smoothing) / float(tgt_vocab_size - 2)
    confidence = 1.0 - float(label_smoothing)
    c_smooth = smoothing * math.log(smoothing)
    c_conf = confidence * math.log(confidence) if confidence > 0.0 else 0.0
    # one_hot[padding_idx] = 0 uses Python-style negative indexing into a vocab-sized buffer.
    pad_col = ignore_index if ignore_index >= 0 else ignore_index + tgt_vocab_size
    assert 0 <= pad_col < V, "padding_idx must address a valid column (as in the PyTorch module)"

    itemsize = jnp.dtype(output.dtype).itemsize

    # ---- generation-aware tile sizing --------------------------------------------------
    try:
        vmem_cap = int(pltpu.get_tpu_info().vmem_capacity_bytes)
    except Exception:
        vmem_cap = 64 * 1024 * 1024                         # conservative (v7x) default
    block_bytes = min(24 * 1024 * 1024, vmem_cap // 5)      # ~12.8 MiB on v7x, 24 MiB on v5e/v6e
    vmem_limit = int(min((vmem_cap * 3) // 4, 64 * 1024 * 1024))

    tv = min(_round_up(V, _LANE), 8192)                     # lane-aligned class tile
    b_pad_full = _round_up(B, _SUB)
    tb = max(_SUB, (block_bytes // (tv * itemsize)) // _SUB * _SUB)
    tb = min(tb, b_pad_full)
    if b_pad_full >= 2 * _SUB:                              # keep both v7x TensorCores busy
        tb = min(tb, _round_up(_cdiv(B, 2), _SUB))
    grid_i = _cdiv(B, tb)
    grid_j = _cdiv(V, tv)
    b_pad = grid_i * tb

    has_row_edge = (B % tb) != 0
    has_col_edge = (V % tv) != 0
    cw = 512 if tv % 512 == 0 else (256 if tv % 256 == 0 else _LANE)

    # Per-row weight: smoothing for real non-ignored rows, 0 for ignored / padded rows.
    tgt = target.astype(jnp.int32)
    not_ignored = tgt != jnp.int32(ignore_index)
    w2d = jnp.where(not_ignored, jnp.float32(smoothing), jnp.float32(0.0)).reshape(B, 1)
    if b_pad != B:
        w2d = jnp.pad(w2d, ((0, b_pad - B), (0, 0)))

    kernel = functools.partial(
        _row_sum_kernel, tb=int(tb), tv=int(tv), cw=int(cw),
        b_total=int(B), v_total=int(V),
        has_row_edge=bool(has_row_edge), has_col_edge=bool(has_col_edge))

    cost = pl.CostEstimate(
        flops=2 * B * V,
        transcendentals=0,
        bytes_accessed=B * V * itemsize + b_pad * 4 + grid_i * _SUB * _LANE * 4)

    partials = pl.pallas_call(
        kernel,
        out_shape=jax.ShapeDtypeStruct((grid_i * _SUB, _LANE), jnp.float32),
        grid_spec=pltpu.PrefetchScalarGridSpec(
            num_scalar_prefetch=0,
            grid=(grid_i, grid_j),
            in_specs=[
                pl.BlockSpec((tb, 1), lambda i, j: (i, 0)),
                pl.BlockSpec((tb, tv), lambda i, j: (i, j)),
            ],
            out_specs=pl.BlockSpec((_SUB, _LANE), lambda i, j: (i, 0)),
        ),
        compiler_params=pltpu.CompilerParams(
            dimension_semantics=("parallel", "arbitrary"),
            vmem_limit_bytes=vmem_limit),
        cost_estimate=cost,
    )(w2d, output)

    # smoothing * sum over non-ignored rows of (sum over ALL V columns of logq)
    weighted_rowsum_total = jnp.sum(partials)

    # ---- tiny per-row corrections (plain XLA: one gather + one column slice) ------------
    safe_idx = jnp.clip(tgt, 0, V - 1)
    g = jnp.take_along_axis(output, safe_idx[:, None], axis=1)[:, 0].astype(jnp.float32)
    pcol = output[:, pad_col].astype(jnp.float32)
    tgt_is_pad = tgt == jnp.int32(pad_col)
    n_smooth = jnp.where(tgt_is_pad, jnp.float32(V - 1), jnp.float32(V - 2))
    per_row = (n_smooth * jnp.float32(c_smooth)
               + jnp.float32(c_conf)
               + jnp.float32(smoothing - confidence) * g
               + jnp.where(tgt_is_pad, jnp.float32(0.0), jnp.float32(smoothing) * pcol))
    const_total = jnp.sum(jnp.where(not_ignored, per_row, jnp.float32(0.0)))

    return const_total - weighted_rowsum_total


def _reference(output, target, *, label_smoothing, tgt_vocab_size, ignore_index):
    """Pure-JAX reference mirroring the PyTorch forward (F.kl_div(output, model_prob, 'sum'))."""
    B, V = output.shape
    smoothing_value = label_smoothing / (tgt_vocab_size - 2)
    confidence = 1.0 - label_smoothing
    pad_col = ignore_index if ignore_index >= 0 else ignore_index + tgt_vocab_size
    col = jnp.arange(V)[None, :]
    p = jnp.full((B, V), smoothing_value, jnp.float32)
    p = jnp.where(col == pad_col, 0.0, p)
    p = jnp.where(col == target[:, None], confidence, p)
    p = jnp.where(target[:, None] == ignore_index, 0.0, p)
    return jnp.sum(jnp.where(p > 0.0, p * (jnp.log(p) - output.astype(jnp.float32)), 0.0))


if __name__ == "__main__":
    B = 12                  # not a multiple of 8 -> exercises the batch-edge (row-masked) path
    tgt_vocab_size = 32
    n_classes = 40          # > tgt_vocab_size -> exercises the "extended" smoothing columns
    label_smoothing = 0.1
    ignore_index = 0        # padding token id (non-negative and < vocab)

    key = jax.random.PRNGKey(0)
    k1, k2 = jax.random.split(key)
    logits = jax.random.normal(k1, (B, n_classes), dtype=jnp.float32)
    output = jax.nn.log_softmax(logits, axis=-1)              # kl_div expects log-probs
    target = jax.random.randint(k2, (B,), 0, tgt_vocab_size, dtype=jnp.int32)
    target = target.at[3].set(ignore_index)                   # one ignored row

    loss = label_smoothing_loss(
        output, target,
        label_smoothing=label_smoothing,
        tgt_vocab_size=tgt_vocab_size,
        ignore_index=ignore_index,
    )
    loss = jax.block_until_ready(loss)

    ref = _reference(output, target,
                     label_smoothing=label_smoothing,
                     tgt_vocab_size=tgt_vocab_size,
                     ignore_index=ignore_index)
    assert jnp.allclose(loss, ref, rtol=1e-4, atol=1e-4), (loss, ref)

    print("KERNEL_OK")
</pallas_src>

<mosaic_0001>
module attributes {stable_mosaic.version = 11 : i64} {
  func.func @_row_sum_kernel(%arg0: i32, %arg1: i32, %arg2: memref<8x1xf32, #tpu.memory_space<vmem>>, %arg3: memref<8x128xf32, #tpu.memory_space<vmem>>, %arg4: memref<8x128xf32, #tpu.memory_space<vmem>>) attributes {dimension_semantics = [#tpu.dimension_semantics<parallel>, #tpu.dimension_semantics<arbitrary>], iteration_bounds = array<i64: 2, 1>, scalar_prefetch = 0 : i64, scratch_operands = 0 : i64, tpu.core_type = #tpu.core_type<tc>, window_params = [{transform_indices = @transform_0, window_bounds = array<i64: 8, 1>}, {transform_indices = @transform_1, window_bounds = array<i64: 8, 128>}, {transform_indices = @transform_2, window_bounds = array<i64: 8, 128>}]} {
    %c0_i32 = arith.constant 0 : i32
    %0 = arith.cmpi eq, %arg1, %c0_i32 : i32
    %1 = arith.extui %0 : i1 to i32
    %c0_i32_0 = arith.constant 0 : i32
    %2 = arith.cmpi ne, %1, %c0_i32_0 : i32
    scf.if %2 {
      %cst = arith.constant 0.000000e+00 : f32
      %13 = vector.broadcast %cst : f32 to vector<8x128xf32>
      %c0 = arith.constant 0 : index
      %c0_4 = arith.constant 0 : index
      %14 = vector.load %arg4[%c0, %c0_4] : memref<8x128xf32, #tpu.memory_space<vmem>>, vector<8x128xf32>
      tpu.vector_store %arg4[%c0, %c0_4], %13 {strides = array<i32>} : memref<8x128xf32, #tpu.memory_space<vmem>>, vector<8x128xf32>,
    } else {
    }
    %3 = tpu.iota {dimensions = array<i32: 1>} : vector<8x128xi32>
    %4 = tpu.iota {dimensions = array<i32: 0>} : vector<8x1xi32>
    %c1_i32 = arith.constant 1 : i32
    %5 = arith.cmpi eq, %arg0, %c1_i32 : i32
    %c0_i32_1 = arith.constant 0 : i32
    %6 = arith.cmpi eq, %arg1, %c0_i32_1 : i32
    %7 = arith.ori %5, %6 : i1
    %true = arith.constant true
    %8 = arith.xori %7, %true : i1
    %9 = arith.extui %8 : i1 to i32
    %c0_i32_2 = arith.constant 0 : i32
    %10 = arith.cmpi ne, %9, %c0_i32_2 : i32
    scf.if %10 {
      %cst = arith.constant 0.000000e+00 : f32
      %13 = vector.broadcast %cst : f32 to vector<8x128xf32>
      %c0_i32_4 = arith.constant 0 : i32
      %c8_i32 = arith.constant 8 : i32
      %14 = arith.muli %c0_i32_4, %c8_i32 : i32
      %15 = tpu.assume_multiple %14, 8 : i32
      %16 = arith.index_cast %15 : i32 to index
      %c0 = arith.constant 0 : index
      %17 = vector.load %arg2[%16, %c0] : memref<8x1xf32, #tpu.memory_space<vmem>>, vector<8x1xf32>
      %cst_5 = arith.constant 0.000000e+00 : f32
      %18 = vector.broadcast %cst_5 : f32 to vector<8x128xf32>
      %19 = arith.index_cast %15 : i32 to index
      %c0_6 = arith.constant 0 : index
      %20 = vector.load %arg3[%19, %c0_6] : memref<8x128xf32, #tpu.memory_space<vmem>>, vector<8x128xf32>
      %21 = arith.addf %18, %20 : vector<8x128xf32>
      %22 = vector.broadcast %17 : vector<8x1xf32> to vector<8x128xf32>
      %23 = arith.mulf %22, %21 : vector<8x128xf32>
      %24 = arith.addf %13, %23 : vector<8x128xf32>
      %c1_i32_7 = arith.constant 1 : i32
      %c0_8 = arith.constant 0 : index
      %c0_9 = arith.constant 0 : index
      %25 = vector.load %arg4[%c0_8, %c0_9] : memref<8x128xf32, #tpu.memory_space<vmem>>, vector<8x128xf32>
      %26 = arith.addf %25, %24 : vector<8x128xf32>
      %c0_10 = arith.constant 0 : index
      %c0_11 = arith.constant 0 : index
      %27 = vector.load %arg4[%c0_10, %c0_11] : memref<8x128xf32, #tpu.memory_space<vmem>>, vector<8x128xf32>
      tpu.vector_store %arg4[%c0_10, %c0_11], %26 {strides = array<i32>} : memref<8x128xf32, #tpu.memory_space<vmem>>, vector<8x128xf32>,
    } else {
    }
    %11 = arith.extui %7 : i1 to i32
    %c0_i32_3 = arith.constant 0 : i32
    %12 = arith.cmpi ne, %11, %c0_i32_3 : i32
    scf.if %12 {
      %cst = arith.constant 0.000000e+00 : f32
      %13 = vector.broadcast %cst : f32 to vector<8x128xf32>
      %c0_i32_4 = arith.constant 0 : i32
      %c8_i32 = arith.constant 8 : i32
      %14 = arith.muli %c0_i32_4, %c8_i32 : i32
      %15 = tpu.assume_multiple %14, 8 : i32
      %16 = arith.index_cast %15 : i32 to index
      %c0 = arith.constant 0 : index
      %17 = vector.load %arg2[%16, %c0] : memref<8x1xf32, #tpu.memory_space<vmem>>, vector<8x1xf32>
      %c8_i32_5 = arith.constant 8 : i32
      %18 = arith.muli %arg0, %c8_i32_5 : i32
      %19 = arith.addi %18, %15 : i32
      %20 = vector.broadcast %19 : i32 to vector<8x1xi32>
      %21 = arith.addi %20, %4 : vector<8x1xi32>
      %c12_i32 = arith.constant 12 : i32
      %22 = vector.broadcast %c12_i32 : i32 to vector<8x1xi32>
      %23 = arith.cmpi slt, %21, %22 : vector<8x1xi32>
      %cst_6 = arith.constant 0.000000e+00 : f32
      %24 = vector.broadcast %cst_6 : f32 to vector<8x128xf32>
      %25 = arith.index_cast %15 : i32 to index
      %c0_7 = arith.constant 0 : index
      %26 = vector.load %arg3[%25, %c0_7] : memref<8x128xf32, #tpu.memory_space<vmem>>, vector<8x128xf32>
      %c128_i32 = arith.constant 128 : i32
      %27 = arith.muli %arg1, %c128_i32 : i32
      %c40_i32 = arith.constant 40 : i32
      %28 = arith.subi %c40_i32, %27 : i32
      %c0_i32_8 = arith.constant 0 : i32
      %29 = arith.subi %28, %c0_i32_8 : i32
      %30 = vector.broadcast %29 : i32 to vector<8x128xi32>
      %31 = arith.cmpi slt, %3, %30 : vector<8x128xi32>
      %32 = vector.broadcast %23 : vector<8x1xi1> to vector<8x128xi1>
      %33 = arith.andi %32, %31 : vector<8x128xi1>
      %cst_9 = arith.constant 0.000000e+00 : f32
      %34 = vector.broadcast %cst_9 : f32 to vector<8x128xf32>
      %35 = arith.select %33, %26, %34 : vector<8x128xi1>, vector<8x128xf32>
      %36 = arith.addf %24, %35 : vector<8x128xf32>
      %37 = vector.broadcast %17 : vector<8x1xf32> to vector<8x128xf32>
      %38 = arith.mulf %37, %36 : vector<8x128xf32>
      %39 = arith.addf %13, %38 : vector<8x128xf32>
      %c1_i32_10 = arith.constant 1 : i32
      %c0_11 = arith.constant 0 : index
      %c0_12 = arith.constant 0 : index
      %40 = vector.load %arg4[%c0_11, %c0_12] : memref<8x128xf32, #tpu.memory_space<vmem>>, vector<8x128xf32>
      %41 = arith.addf %40, %39 : vector<8x128xf32>
      %c0_13 = arith.constant 0 : index
      %c0_14 = arith.constant 0 : index
      %42 = vector.load %arg4[%c0_13, %c0_14] : memref<8x128xf32, #tpu.memory_space<vmem>>, vector<8x128xf32>
      tpu.vector_store %arg4[%c0_13, %c0_14], %41 {strides = array<i32>} : memref<8x128xf32, #tpu.memory_space<vmem>>, vector<8x128xf32>,
    } else {
    }
    return
  }
  func.func @transform_0(%arg0: i32, %arg1: i32) -> (i32, i32) {
    %c0_i32 = arith.constant 0 : i32
    %c0_i32_0 = arith.constant 0 : i32
    return %arg0, %c0_i32 : i32, i32
  }
  func.func @transform_1(%arg0: i32, %arg1: i32) -> (i32, i32) {
    %c0_i32 = arith.constant 0 : i32
    return %arg0, %arg1 : i32, i32
  }
  func.func @transform_2(%arg0: i32, %arg1: i32) -> (i32, i32) {
    %c0_i32 = arith.constant 0 : i32
    %c0_i32_0 = arith.constant 0 : i32
    return %arg0, %c0_i32 : i32, i32
  }
}

</mosaic_0001>

<bundles_post_ra>
// kernel: tpu_custom_call.1
= control target key start
LH: loop header
LB: loop body
LE: loop exit
PB: predicated region body
PF: predicated region fallthrough
CT: control target
= control target key end

     0   :  { %7 = vsyncpa [#allocation3], 0  ;;  %s615_s0 = inlined_call_operand.vmem [shape: f32[16,1], index: 0, kind: input, shape index: {}]   ;;  %s616_s1 = inlined_call_operand.vmem [shape: f32[12,40], index: 1, kind: input, shape index: {}]   ;;  %s617_s2 = inlined_call_operand.hbm [shape: f32[16,128], index: 2, kind: output, shape index: {}]  }
   0x1   :  { %9 = vsyncpa [#allocation3 + $0x1], 0  ;;  %s499_s9 = smov 0   ;;  %s501_s10 = smov 0  }
   0x2   :  { %s503_s11 = smov 0   ;;  %s505_s12 = smov 0  }
   0x3   :  { %s507_s13 = smov 0   ;;  %s509_s14 = smov 0  }
   0x4 LB: > { %s331_s15 = sadd.s32 4294967295, %s480_s14   ;;  %s332_s16 = sadd.s32 4294967294, %s480_s14   ;;  %s480_s14 = sphi %s509_s14, %s15_s14   ;;  %s476_s13 = sphi %s507_s13, %s624_s13   ;;  %s472_s12 = sphi %s505_s12, %s623_s12   ;;  %s468_s11 = sphi %s503_s11, %s622_s11   ;;  %s464_s10 = sphi %s501_s10, %s621_s10   ;;  %s460_s9 = sphi %s499_s9, %s620_s9  }
   0x5   : > { %s27_s17 = sadd.s32 1, %s476_s13  ;;  %s88_s18 = sadd.s32 1, %s468_s11 }
   0x6   : > { %p29_p0 = scmp.ge.s32.totalorder %s27_s17, 2  ;;  %p98_p1 = scmp.ne.s32.totalorder %s468_s11, %s464_s10 }
   0x7   : > { %p99_p2 = scmp.eq.s32.totalorder %s331_s15, 1  ;;  %p104_p3 = scmp.ne.s32.totalorder %s464_s10, %s460_s9 }
   0x8   : > { %s626_s17 = smov (%p29_p0, %s27_s17), 0  ;;  %p105_p5 = scmp.eq.s32.totalorder %s332_s16, 1 }
   0x9   : > { %p539_p4 = por %p99_p2, %p98_p1  ;;  %s85_s20 = ssub.s32 %s476_s13, %s626_s17 }
   0xa   : > { %p335_p6 = scmp.ge.s32.totalorder %s480_s14, 1  ;;  %p86_p7 = scmp.eq.s32.totalorder %s85_s20, 0 }
   0xb   : > { %p546_p8 = por %p105_p5, %p104_p3  ;;  %p140_p9 = scmp.lt.s32.totalorder %s480_s14, 3 }
   0xc   : > { %s552_s22 = scalar_select %p86_p7, %s468_s11, %s88_s18  }
   0xd   : > { %p141_p10 = pnand %p335_p6, %p140_p9 }
   0xe   : > { %p168_p11 = scmp.lt.s32.totalorder (!%p141_p10), %s472_s12, 1  ;;  %v482_v0 = vmov (!%p141_p10), 0   ;;  %v184_v2 = vlaneseq (!%p141_p10)  ;;  %s339_s28 = sshll.u32 (!%p141_p10), %s472_s12, 3 }
   0xf   : > { %144 = sbr.rel (%p141_p10) target bundleno = 171 (0xab), region = 28  ;;  %401 = vset.pattern.permute.xlu0 (!%p141_p10), %v482_v0  ;;  %v196_v4 = vstv (!%p141_p10), %s339_s28  ;;  %s165_s29 = sand.u32 (!%p141_p10), 1, %s464_s10  }
  0x10   : > { %v187_v3 = vshrl.u32 (!%p141_p10), %v184_v2, 7  ;;  %v185_v5 = vand.u32 (!%p141_p10), 127, %v184_v2  ;;  %s336_s5 = sshll.u32 (!%p141_p10), %s165_s29, 3  ;;  %s341_s6 = sshll.u32 (!%p141_p10), %s472_s12, 7 }
  0x11   : > { %s167_s7 = scalar_lea.vmem (!%p141_p10), [#allocation2], %s336_s5  ;;  %s568_s18 = scalar_lea.hbm (!%p141_p10), %s617_s2, %s341_s6 }
  0x12   : > { %v197_v6 = vadd.s32 (!%p141_p10), %v196_v4, %v187_v3  ;;  %vm203_vm1 = vcmp.lt.s32.totalorder (!%p141_p10), %v185_v5, 40  ;;  %s249_s8 = sshll.u32 (!%p141_p10), %s167_s7, 4  ;;  %s236_s20 = scalar_lea.sflag (!%p141_p10), [#allocation3], %s165_s29  ;;  %s570_s8 = int_to_ptr.vmem [resolvable:$true] %s249_s8 }
  0x14   : > { %vm198_vm0 = vcmp.lt.s32.totalorder (!%p141_p10), %v197_v6, 12 }
  0x15   : > { %vm206_vm2 = vmand (!%p141_p10), %vm198_vm0, %vm203_vm1 }
  0x16   : > { %s169_s23 = scalar_select %p168_p11, %s472_s12, 1 }
  0x17   : > { %s483_s12 = smov [#allocation2]  }
  0x18   : > { %s337_s24 = sshll.u32 %s169_s23, 3  ;;  %s402_s23 = scalar_lea.vmem %s570_s8, 128 }
  0x19   : > { %s171_s27 = scalar_lea.vmem %s615_s0, %s337_s24  ;;  %s178_s4 = scalar_lea.vmem %s616_s1, %s337_s24 }
  0x1a   : > { %v193_v1 = vld [vmem:[%s171_s27] sm:$0xff]  ;;  %p403_p12 = scmp.ne.s32.totalorder %s570_s8, %s402_s23  ;;  %s406_s24 = sshll.u32 %s483_s12, 4  ;;  %s407_s24 = int_to_ptr.vmem [resolvable:$false] %s406_s24 }
  0x1b   : > { %211 = vperm.xlu0 %401, %v193_v1   ;;  %v199_v7 = vld [vmem:[%s178_s4] sm:$0xff]  ;;  %s408_s25 = scalar_lea.vmem %s407_s24, 256  ;;  %p409_p1 = scmp.lt.s32.totalorder %s570_s8, %s407_s24 }
  0x1c   : > { %v207_v8 = vsel %vm206_vm2, %v199_v7, 0.0  ;;  %p404_p13 = pnand %p403_p12, %p539_p4  ;;  %p410_p2 = scmp.lt.s32.totalorder %s408_s25, %s402_s23 }
  0x1e   : > { %p405_p0 = pneg %p404_p13  ;;  %p411_p3 = por %p410_p2, %p409_p1 }
  0x20   : > { %p412_p5 = pnand %p411_p3, %p405_p0 }
  0x9a   : > { %v212_v9 = vpop.permute.xlu0 %211 }
  0x9b   : > { %v214_v10 = vmul.f32 %v212_v9, %v207_v8 }
  0x9d   : > { %218 = vst [vmem:[%s167_s7] sm:$0xff] %v214_v10 }
  0x9e   : > { %415 = shalt.err (!%p412_p5)
}
  0x9f   : > { %s416_s26 = scalar_lea.hbm %s568_s18, 128  ;;  %s420_s29 = scalar_lea.hbm %s617_s2, 256 }
  0xa0   : > { %p417_p6 = scmp.ne.s32.totalorder %s568_s18, %s416_s26  ;;  %p421_p10 = scmp.lt.u32.totalorder %s568_s18, %s617_s2 }
  0xa1   : > { %p422_p11 = scmp.lt.u32.totalorder %s420_s29, %s416_s26  ;;  %p424_p13 = scmp.lt.u32.totalorder %s416_s26, %s568_s18 }
  0xa2   : > { %p418_p7 = pnand %p417_p6, %p539_p4 }
  0xa3   : > { %p423_p12 = por %p422_p11, %p421_p10 }
  0xa4   : > { %p419_p9 = pneg %p418_p7 }
  0xa5   : > { %p425_p0 = por %p424_p13, %p423_p12 }
  0xa7   : > { %p426_p1 = pnand %p425_p0, %p419_p9 }
  0xa9   : > { %429 = shalt.err (!%p426_p1)
}
  0xaa   : > { %344 = dma.vmem_to_hbm [thread:$0]  (%p539_p4), %s570_s8, 128, %s568_s18, %s236_s20  }
  0xab PF: > { %p350_p2 = scmp.ge.s32.totalorder %s480_s14, 2  ;;  %s261_s4 = sand.u32 1, %s460_s9  }
  0xac   : > { %s262_s5 = scalar_lea.sflag [#allocation3], %s261_s4 }
  0xad   : > { %p347_p3 = pnand %p350_p2, %p546_p8 }
  0xaf   : > { %455 = dma.done.wait (!%p347_p3), %s262_s5, 128  }
  0xb0   : > { %457 = vsyncadd (!%p347_p3), %s262_s5, 4294967168  ;;  %s15_s14 = sadd.s32 1, %s480_s14   ;;  %s620_s9 = smov %s464_s10 }
  0xb1   : > { %p12_p5 = scmp.ge.s32.totalorder %s15_s14, 4   ;;  %s621_s10 = smov %s468_s11 }
  0xb2   : > { %s622_s11 = smov %s552_s22  ;;  %s623_s12 = smov %s476_s13 }
  0xb3   : > { %s624_s13 = smov %s626_s17  ;;  %14 = sbr.rel (!%p12_p5) target bundleno = 4 (0x4), region = 78 }
  0xba   :  { %267 = vsyncpa [#allocation3], 1 }
  0xbb   :  { %269 = vsyncpa [#allocation3 + $0x1], 1 }

</bundles_post_ra>
